<compile_context>
chip_gen: v7x
topology: tpu7x:2x2x1
jax: 0.10.0
libtpu: 0.0.40
codegen_flags: <defaults>
</compile_context>

<pallas_src>
import math

import jax
import jax.numpy as jnp
from jax.experimental import pallas as pl
from jax.experimental.pallas import tpu as pltpu


# ----------------------------------------------------------------------------
# Kernels
# ----------------------------------------------------------------------------
def _lora_linear_kernel(x_ref, wb_ref, t_ref, bs_ref, scale_ref, bias_ref,
                        out_ref, acc_ref):
    """One (tm, tn) output tile; K is the innermost grid (reduction) axis.

    x_ref    : (tm, tk)      bf16   activation rows
    wb_ref   : (tk, tn)      bf16   base weight (transposed, K/N tiled)
    t_ref    : (tm, rank_p)  bf16   t = x @ lora_A^T (precomputed once per fwd)
    bs_ref   : (rank_p, tn)  bf16   lora_B^T (N tiled, unscaled)
    scale_ref: (1, tn)       f32    adjust * multiplier * alpha/rank
    bias_ref : (1, tn)       f32    base bias
    out_ref  : (tm, tn)      bf16
    acc_ref  : (tm, tn)      f32    accumulator scratch (persists across k)
    """
    k = pl.program_id(2)

    @pl.when(k == 0)
    def _():
        acc_ref[...] = jnp.zeros_like(acc_ref)

    acc_ref[...] += jnp.dot(x_ref[...], wb_ref[...],
                            preferred_element_type=jnp.float32)

    @pl.when(k == pl.num_programs(2) - 1)
    def _():
        lora = jnp.dot(t_ref[...], bs_ref[...],
                       preferred_element_type=jnp.float32)
        out = acc_ref[...] + lora * scale_ref[...] + bias_ref[...]
        out_ref[...] = out.astype(out_ref.dtype)


def _fused_linear_kernel(x_ref, wb_ref, bias_ref, out_ref, acc_ref):
    """Fused deployment mode: LoRA delta already folded into the base weight."""
    k = pl.program_id(2)

    @pl.when(k == 0)
    def _():
        acc_ref[...] = jnp.zeros_like(acc_ref)

    acc_ref[...] += jnp.dot(x_ref[...], wb_ref[...],
                            preferred_element_type=jnp.float32)

    @pl.when(k == pl.num_programs(2) - 1)
    def _():
        out_ref[...] = (acc_ref[...] + bias_ref[...]).astype(out_ref.dtype)


# ----------------------------------------------------------------------------
# Host-side helpers
# ----------------------------------------------------------------------------
def _round_up(x, m):
    return ((x + m - 1) // m) * m


def _largest_divisor_tile(dim, max_tile, quantum):
    """Largest multiple of `quantum` dividing `dim`, capped at `max_tile`."""
    if dim <= max_tile:
        return dim
    t = (max_tile // quantum) * quantum
    while t >= quantum:
        if dim % t == 0:
            return t
        t -= quantum
    return dim


def _vmem_capacity_bytes():
    try:
        return int(pltpu.get_tpu_info().vmem_capacity_bytes)
    except Exception:
        return 64 * 1024 * 1024  # conservative default: v7x has 64 MiB per TC


def _select_tiles(M, K, N_pad, rank_p, has_lora):
    """Pick (tm, tn, tk, vmem_limit_bytes) from the generation's VMEM capacity.

    Preference order:
      * lane-dense tn, a multiple of 256 on the 256-wide MXU parts when possible;
      * tk == K (base weight streamed from HBM exactly once per forward);
      * tile K (innermost 'arbitrary' axis + f32 acc scratch) only when full-K
        blocks would exceed the budget (large in_features, v7x's 64 MiB);
      * shrink tn / tm as a last resort.
    """
    cap = _vmem_capacity_bytes()
    budget = int(0.55 * cap)
    big_vmem = cap >= 100 * 1024 * 1024            # v5e / v6e (128 MiB)
    tm_max, tn_max = (512, 1024) if big_vmem else (256, 512)

    def est(tm, tn, tk):
        b = 2 * 2 * (tm * tk + tk * tn + tm * tn)   # double-buffered bf16 x/W/out
        b += tm * tn * 4                            # f32 accumulator scratch
        b += 2 * tm * tn * 4                        # f32 dot temporaries
        if has_lora:
            b += 2 * 2 * (tm * rank_p + rank_p * tn)  # t, B^T (double-buffered bf16)
            b += 2 * 2 * tn * 4                       # scale + bias rows (f32)
        else:
            b += 2 * tn * 4
        return b

    quantum = 256 if N_pad % 256 == 0 else 128
    tn = _largest_divisor_tile(N_pad, tn_max, quantum)
    tm = min(tm_max, _round_up(max(M, 1), 16))

    def pick_tk(tm_, tn_):
        if est(tm_, tn_, K) <= budget or K % 128 != 0:
            # Full K resident (or K not cleanly tileable -> keep it resident).
            return K
        tk = ((K - 1) // 128) * 128
        while tk >= 128:
            if K % tk == 0 and est(tm_, tn_, tk) <= budget:
                return tk
            tk -= 128
        return 128

    tk = pick_tk(tm, tn)
    while est(tm, tn, tk) > budget and (tn > quantum or tm > 16):
        if tn > quantum:
            tn = _largest_divisor_tile(N_pad, max(tn // 2, quantum), quantum)
        else:
            tm = max(16, _round_up(tm // 2, 16))
        tk = pick_tk(tm, tn)

    vmem_limit = min(int(0.9 * cap), max(est(tm, tn, tk) + (8 << 20), 32 << 20))
    return tm, tn, tk, vmem_limit


def prepare_lora_linear_params(base_w, base_b, lora_a_w, lora_b_w, adjust_w, *,
                               multiplier, alpha, rank,
                               weight_dtype=jnp.bfloat16, fuse_lora=False):
    """One-time (load-time) weight prep, hoisted out of the forward hot path.

    base_w:   (out, in)    base nn.Linear weight
    base_b:   (out,)       base nn.Linear bias (or None)
    lora_a_w: (rank, in)   lora_A weight
    lora_b_w: (out, rank)  lora_B weight
    adjust_w: (out, 1)     adjust_layer weight

    NOTE: multiplier / adjust / alpha are baked in here; if the module changes
    them at call time, prepare must be re-run.  `fuse_lora=True` additionally
    folds the whole LoRA delta into the base weight (single-GEMM kernel); only
    valid when the adapter is static and the base weight is not shared across
    multiple live adapters.
    """
    out_features, in_features = base_w.shape
    n_pad = _round_up(out_features, 128)       # lane-dense output tiles
    rank_p = max(8, _round_up(rank, 8))        # sublane-friendly, zero-padded

    # Per-output-column LoRA scale, kept in f32 (applied on the f32 accumulator
    # inside the kernel -> no extra bf16 rounding vs. the reference).
    scale = (adjust_w.astype(jnp.float32)[:, 0]
             * jnp.float32(multiplier) * jnp.float32(alpha / rank))     # (out,)

    wb_t = jnp.zeros((in_features, n_pad), jnp.float32)
    wb_t = wb_t.at[:, :out_features].set(
        jnp.transpose(base_w).astype(jnp.float32))

    bias_row = jnp.zeros((1, n_pad), jnp.float32)
    if base_b is not None:
        bias_row = bias_row.at[0, :out_features].set(base_b.astype(jnp.float32))

    params = {
        "out_features": out_features,
        "rank_p": rank_p,
        "fused": bool(fuse_lora),
        "bias_row": bias_row,
    }

    if fuse_lora:
        delta = (jnp.transpose(lora_a_w).astype(jnp.float32)
                 @ (jnp.transpose(lora_b_w).astype(jnp.float32) * scale[None, :]))
        wb_t = wb_t.at[:, :out_features].add(delta)
        params["wb_t"] = wb_t.astype(weight_dtype)
        params["a_t"] = None
        params["bs_t"] = None
        params["scale_row"] = None
    else:
        a_t = jnp.zeros((in_features, rank_p), weight_dtype)
        a_t = a_t.at[:, :rank].set(jnp.transpose(lora_a_w).astype(weight_dtype))

        bs_t = jnp.zeros((rank_p, n_pad), weight_dtype)
        bs_t = bs_t.at[:rank, :out_features].set(
            jnp.transpose(lora_b_w).astype(weight_dtype))

        scale_row = jnp.zeros((1, n_pad), jnp.float32)
        scale_row = scale_row.at[0, :out_features].set(scale)

        params["wb_t"] = wb_t.astype(weight_dtype)
        params["a_t"] = a_t
        params["bs_t"] = bs_t
        params["scale_row"] = scale_row
    return params


def lora_linear_forward(x, params, *, out_dtype=jnp.bfloat16):
    """x: (..., in_features). Returns (..., out_features) in out_dtype."""
    wb_t = params["wb_t"]
    bias_row = params["bias_row"]
    fused = params["fused"]
    out_features = params["out_features"]
    rank_p = params["rank_p"]

    in_features, n_pad = wb_t.shape
    lead_shape = x.shape[:-1]
    x2d = x.reshape(-1, in_features).astype(wb_t.dtype)
    M = x2d.shape[0]

    tm, tn, tk, vmem_limit = _select_tiles(M, in_features, n_pad, rank_p,
                                           has_lora=not fused)
    # Grid: N outermost (megacore shards along N on v7x -> each TC reads half
    # of W), M middle (partial last block clipped, no host pad), K innermost
    # reduction ("arbitrary") accumulated in an f32 VMEM scratch.  When tk == K
    # the base weight is streamed from HBM exactly once per forward.
    grid = (n_pad // tn, pl.cdiv(M, tm), in_features // tk)

    flops = 2 * M * in_features * n_pad
    bytes_accessed = (x2d.size * x2d.dtype.itemsize
                      + wb_t.size * wb_t.dtype.itemsize
                      + bias_row.size * bias_row.dtype.itemsize
                      + M * n_pad * jnp.dtype(out_dtype).itemsize)

    common_kwargs = dict(
        out_shape=jax.ShapeDtypeStruct((M, n_pad), out_dtype),
        compiler_params=pltpu.CompilerParams(
            dimension_semantics=("parallel", "parallel", "arbitrary"),
            vmem_limit_bytes=vmem_limit),
    )

    x_spec = pl.BlockSpec((tm, tk), lambda j, i, k: (i, k))
    w_spec = pl.BlockSpec((tk, tn), lambda j, i, k: (k, j))
    row_spec = pl.BlockSpec((1, tn), lambda j, i, k: (0, j))
    out_spec = pl.BlockSpec((tm, tn), lambda j, i, k: (i, j))
    scratch = [pltpu.VMEM((tm, tn), jnp.float32)]

    if fused:
        out2d = pl.pallas_call(
            _fused_linear_kernel,
            grid_spec=pltpu.PrefetchScalarGridSpec(
                num_scalar_prefetch=0, grid=grid,
                in_specs=[x_spec, w_spec, row_spec],
                out_specs=out_spec, scratch_shapes=scratch),
            cost_estimate=pl.CostEstimate(flops=flops, transcendentals=0,
                                          bytes_accessed=bytes_accessed),
            **common_kwargs,
        )(x2d, wb_t, bias_row)
    else:
        a_t, bs_t, scale_row = params["a_t"], params["bs_t"], params["scale_row"]
        # Tiny (M, rank_p) GEMM hoisted out of the kernel: computed once per
        # forward instead of being recomputed for every N tile.
        t = jnp.dot(x2d, a_t,
                    preferred_element_type=jnp.float32).astype(wb_t.dtype)
        flops += 2 * M * in_features * rank_p + 2 * M * rank_p * n_pad
        bytes_accessed += (t.size * t.dtype.itemsize
                           + a_t.size * a_t.dtype.itemsize
                           + bs_t.size * bs_t.dtype.itemsize
                           + scale_row.size * scale_row.dtype.itemsize)
        out2d = pl.pallas_call(
            _lora_linear_kernel,
            grid_spec=pltpu.PrefetchScalarGridSpec(
                num_scalar_prefetch=0, grid=grid,
                in_specs=[
                    x_spec,
                    w_spec,
                    pl.BlockSpec((tm, rank_p), lambda j, i, k: (i, 0)),
                    pl.BlockSpec((rank_p, tn), lambda j, i, k: (0, j)),
                    row_spec,   # scale row
                    row_spec,   # bias row
                ],
                out_specs=out_spec, scratch_shapes=scratch),
            cost_estimate=pl.CostEstimate(flops=flops, transcendentals=0,
                                          bytes_accessed=bytes_accessed),
            **common_kwargs,
        )(x2d, wb_t, t, bs_t, scale_row, bias_row)

    if n_pad != out_features:
        out2d = out2d[:, :out_features]
    return out2d.reshape(*lead_shape, out_features)


# ----------------------------------------------------------------------------
# Demo / correctness check
# ----------------------------------------------------------------------------
if __name__ == "__main__":
    # Small shapes consistent with the module's Linear branch (3-D input path).
    batch, seq, in_features, out_features, rank = 2, 8, 32, 32, 4
    multiplier, alpha = 0.7, 8.0
    weight_dtype = jnp.bfloat16

    key = jax.random.PRNGKey(0)
    kx, kwb, kbb, ka, kb, kadj = jax.random.split(key, 6)

    x = jax.random.normal(kx, (batch, seq, in_features),
                          dtype=jnp.float32).astype(jnp.bfloat16)

    # Base nn.Linear params (torch default init range).
    bbound = 1.0 / math.sqrt(in_features)
    base_w = jax.random.uniform(kwb, (out_features, in_features),
                                minval=-bbound, maxval=bbound,
                                dtype=jnp.float32).astype(weight_dtype)
    base_b = jax.random.uniform(kbb, (out_features,),
                                minval=-bbound, maxval=bbound,
                                dtype=jnp.float32).astype(weight_dtype)

    # lora_A: kaiming_uniform_(a=sqrt(1)) -> bound = sqrt(3/fan_in)
    abound = math.sqrt(3.0 / in_features)
    lora_a_w = jax.random.uniform(ka, (rank, in_features),
                                  minval=-abound, maxval=abound,
                                  dtype=jnp.float32).astype(weight_dtype)
    # Module inits lora_B=0 / adjust=1; use non-trivial (post-training-like)
    # values so the LoRA path is actually exercised by the check.
    lora_b_w = (0.1 * jax.random.normal(kb, (out_features, rank),
                                        dtype=jnp.float32)).astype(weight_dtype)
    adjust_w = (1.0 + 0.1 * jax.random.normal(kadj, (out_features, 1),
                                              dtype=jnp.float32)).astype(weight_dtype)

    # Reference in f32, following the PyTorch module's order of operations.
    x32 = x.astype(jnp.float32).reshape(-1, in_features)
    base_ref = x32 @ base_w.astype(jnp.float32).T + base_b.astype(jnp.float32)
    lora_ref = (x32 @ lora_a_w.astype(jnp.float32).T) @ lora_b_w.astype(jnp.float32).T
    scale_ref = adjust_w.astype(jnp.float32)[:, 0] * multiplier
    ref = (base_ref + lora_ref * scale_ref * (alpha / rank)
           ).reshape(batch, seq, out_features)

    # Unfused path (adapter kept separate; multiplier/adjust can be re-prepared).
    params = prepare_lora_linear_params(
        base_w, base_b, lora_a_w, lora_b_w, adjust_w,
        multiplier=multiplier, alpha=alpha, rank=rank,
        weight_dtype=weight_dtype, fuse_lora=False)
    out = lora_linear_forward(x, params)
    jax.block_until_ready(out)
    assert out.shape == (batch, seq, out_features)
    assert jnp.allclose(out.astype(jnp.float32), ref, atol=3e-2, rtol=3e-2)

    # Fused deployment mode (static adapter folded into the base weight).
    params_fused = prepare_lora_linear_params(
        base_w, base_b, lora_a_w, lora_b_w, adjust_w,
        multiplier=multiplier, alpha=alpha, rank=rank,
        weight_dtype=weight_dtype, fuse_lora=True)
    out_fused = lora_linear_forward(x, params_fused)
    jax.block_until_ready(out_fused)
    assert out_fused.shape == (batch, seq, out_features)
    assert jnp.allclose(out_fused.astype(jnp.float32), ref, atol=3e-2, rtol=3e-2)

    # TODO(synk): Conv2d branch of LoRALayer (lora_A as a strided conv) is not
    # implemented here; only the nn.Linear base-layer path is covered.
    print("KERNEL_OK")
</pallas_src>

<mosaic_0001>
module attributes {stable_mosaic.version = 11 : i64} {
  func.func @_lora_linear_kernel(%arg0: i32, %arg1: i32, %arg2: i32, %arg3: memref<16x32xbf16, #tpu.memory_space<vmem>>, %arg4: memref<32x128xbf16, #tpu.memory_space<vmem>>, %arg5: memref<16x8xbf16, #tpu.memory_space<vmem>>, %arg6: memref<8x128xbf16, #tpu.memory_space<vmem>>, %arg7: memref<1x128xf32, #tpu.memory_space<vmem>>, %arg8: memref<1x128xf32, #tpu.memory_space<vmem>>, %arg9: memref<16x128xbf16, #tpu.memory_space<vmem>>, %arg10: memref<16x128xf32, #tpu.memory_space<vmem>>) attributes {dimension_semantics = [#tpu.dimension_semantics<parallel>, #tpu.dimension_semantics<parallel>, #tpu.dimension_semantics<arbitrary>], iteration_bounds = array<i64: 1, 1, 1>, scalar_prefetch = 0 : i64, scratch_operands = 1 : i64, tpu.core_type = #tpu.core_type<tc>, window_params = [{transform_indices = @transform_0, window_bounds = array<i64: 16, 32>}, {transform_indices = @transform_1, window_bounds = array<i64: 32, 128>}, {transform_indices = @transform_2, window_bounds = array<i64: 16, 8>}, {transform_indices = @transform_3, window_bounds = array<i64: 8, 128>}, {transform_indices = @transform_4, window_bounds = array<i64: 1, 128>}, {transform_indices = @transform_5, window_bounds = array<i64: 1, 128>}, {transform_indices = @transform_6, window_bounds = array<i64: 16, 128>}]} {
    %c0_i32 = arith.constant 0 : i32
    %0 = arith.cmpi eq, %arg2, %c0_i32 : i32
    %1 = arith.extui %0 : i1 to i32
    %c0_i32_0 = arith.constant 0 : i32
    %2 = arith.cmpi ne, %1, %c0_i32_0 : i32
    scf.if %2 {
      %cst_10 = arith.constant 0.000000e+00 : f32
      %12 = vector.broadcast %cst_10 : f32 to vector<16x128xf32>
      %c0_11 = arith.constant 0 : index
      %c0_12 = arith.constant 0 : index
      %13 = vector.load %arg10[%c0_11, %c0_12] : memref<16x128xf32, #tpu.memory_space<vmem>>, vector<16x128xf32>
      tpu.vector_store %arg10[%c0_11, %c0_12], %12 {strides = array<i32>} : memref<16x128xf32, #tpu.memory_space<vmem>>, vector<16x128xf32>,
    } else {
    }
    %c0 = arith.constant 0 : index
    %c0_1 = arith.constant 0 : index
    %3 = vector.load %arg10[%c0, %c0_1] : memref<16x128xf32, #tpu.memory_space<vmem>>, vector<16x128xf32>
    %c0_2 = arith.constant 0 : index
    %c0_3 = arith.constant 0 : index
    %4 = vector.load %arg3[%c0_2, %c0_3] : memref<16x32xbf16, #tpu.memory_space<vmem>>, vector<16x32xbf16>
    %c0_4 = arith.constant 0 : index
    %c0_5 = arith.constant 0 : index
    %5 = vector.load %arg4[%c0_4, %c0_5] : memref<32x128xbf16, #tpu.memory_space<vmem>>, vector<32x128xbf16>
    %cst = arith.constant dense<0.000000e+00> : vector<16x128xf32>
    %6 = tpu.matmul %4, %5, %cst {dimension_numbers = #tpu.dot_dimension_numbers<[1], [0], [0], [1], [0, 0, 1, 1], [], []>} : vector<16x32xbf16>, vector<32x128xbf16>, vector<16x128xf32> -> vector<16x128xf32>
    %7 = arith.addf %3, %6 : vector<16x128xf32>
    %c0_6 = arith.constant 0 : index
    %c0_7 = arith.constant 0 : index
    %8 = vector.load %arg10[%c0_6, %c0_7] : memref<16x128xf32, #tpu.memory_space<vmem>>, vector<16x128xf32>
    tpu.vector_store %arg10[%c0_6, %c0_7], %7 {strides = array<i32>} : memref<16x128xf32, #tpu.memory_space<vmem>>, vector<16x128xf32>,
    %c0_i32_8 = arith.constant 0 : i32
    %9 = arith.cmpi eq, %arg2, %c0_i32_8 : i32
    %10 = arith.extui %9 : i1 to i32
    %c0_i32_9 = arith.constant 0 : i32
    %11 = arith.cmpi ne, %10, %c0_i32_9 : i32
    scf.if %11 {
      %c0_10 = arith.constant 0 : index
      %c0_11 = arith.constant 0 : index
      %12 = vector.load %arg5[%c0_10, %c0_11] : memref<16x8xbf16, #tpu.memory_space<vmem>>, vector<16x8xbf16>
      %c0_12 = arith.constant 0 : index
      %c0_13 = arith.constant 0 : index
      %13 = vector.load %arg6[%c0_12, %c0_13] : memref<8x128xbf16, #tpu.memory_space<vmem>>, vector<8x128xbf16>
      %cst_14 = arith.constant dense<0.000000e+00> : vector<16x128xf32>
      %14 = tpu.matmul %12, %13, %cst_14 {dimension_numbers = #tpu.dot_dimension_numbers<[1], [0], [0], [1], [0, 0, 1, 1], [], []>} : vector<16x8xbf16>, vector<8x128xbf16>, vector<16x128xf32> -> vector<16x128xf32>
      %c0_15 = arith.constant 0 : index
      %c0_16 = arith.constant 0 : index
      %15 = vector.load %arg10[%c0_15, %c0_16] : memref<16x128xf32, #tpu.memory_space<vmem>>, vector<16x128xf32>
      %c0_17 = arith.constant 0 : index
      %c0_18 = arith.constant 0 : index
      %16 = vector.load %arg7[%c0_17, %c0_18] : memref<1x128xf32, #tpu.memory_space<vmem>>, vector<1x128xf32>
      %17 = vector.broadcast %16 : vector<1x128xf32> to vector<16x128xf32>
      %18 = arith.mulf %14, %17 : vector<16x128xf32>
      %19 = arith.addf %15, %18 : vector<16x128xf32>
      %c0_19 = arith.constant 0 : index
      %c0_20 = arith.constant 0 : index
      %20 = vector.load %arg8[%c0_19, %c0_20] : memref<1x128xf32, #tpu.memory_space<vmem>>, vector<1x128xf32>
      %21 = vector.broadcast %20 : vector<1x128xf32> to vector<16x128xf32>
      %22 = arith.addf %19, %21 : vector<16x128xf32>
      %23 = arith.truncf %22 : vector<16x128xf32> to vector<16x128xbf16>
      %c0_21 = arith.constant 0 : index
      %c0_22 = arith.constant 0 : index
      %24 = vector.load %arg9[%c0_21, %c0_22] : memref<16x128xbf16, #tpu.memory_space<vmem>>, vector<16x128xbf16>
      tpu.vector_store %arg9[%c0_21, %c0_22], %23 {strides = array<i32>} : memref<16x128xbf16, #tpu.memory_space<vmem>>, vector<16x128xbf16>,
    } else {
    }
    return
  }
  func.func @transform_0(%arg0: i32, %arg1: i32, %arg2: i32) -> (i32, i32) {
    %c0_i32 = arith.constant 0 : i32
    return %arg1, %arg2 : i32, i32
  }
  func.func @transform_1(%arg0: i32, %arg1: i32, %arg2: i32) -> (i32, i32) {
    %c0_i32 = arith.constant 0 : i32
    return %arg2, %arg0 : i32, i32
  }
  func.func @transform_2(%arg0: i32, %arg1: i32, %arg2: i32) -> (i32, i32) {
    %c0_i32 = arith.constant 0 : i32
    %c0_i32_0 = arith.constant 0 : i32
    return %arg1, %c0_i32 : i32, i32
  }
  func.func @transform_3(%arg0: i32, %arg1: i32, %arg2: i32) -> (i32, i32) {
    %c0_i32 = arith.constant 0 : i32
    %c0_i32_0 = arith.constant 0 : i32
    return %c0_i32, %arg0 : i32, i32
  }
  func.func @transform_4(%arg0: i32, %arg1: i32, %arg2: i32) -> (i32, i32) {
    %c0_i32 = arith.constant 0 : i32
    %c0_i32_0 = arith.constant 0 : i32
    return %c0_i32, %arg0 : i32, i32
  }
  func.func @transform_5(%arg0: i32, %arg1: i32, %arg2: i32) -> (i32, i32) {
    %c0_i32 = arith.constant 0 : i32
    %c0_i32_0 = arith.constant 0 : i32
    return %c0_i32, %arg0 : i32, i32
  }
  func.func @transform_6(%arg0: i32, %arg1: i32, %arg2: i32) -> (i32, i32) {
    %c0_i32 = arith.constant 0 : i32
    return %arg1, %arg0 : i32, i32
  }
}

</mosaic_0001>

<bundles_post_ra>
// kernel: tpu_custom_call.1
= control target key start
LH: loop header
LB: loop body
LE: loop exit
PB: predicated region body
PF: predicated region fallthrough
CT: control target
= control target key end

     0   :  { %11 = vsyncpa [#allocation4], 0  ;;  %s408_s0 = inlined_call_operand.vmem [shape: bf16[16,32], index: 0, kind: input, shape index: {}]   ;;  %s409_s1 = inlined_call_operand.hbm [shape: bf16[32,128], index: 1, kind: input, shape index: {}]   ;;  %s410_s2 = inlined_call_operand.vmem [shape: bf16[16,8], index: 2, kind: input, shape index: {}]   ;;  %s411_s3 = inlined_call_operand.vmem [shape: bf16[8,128], index: 3, kind: input, shape index: {}]   ;;  %s412_s4 = inlined_call_operand.vmem [shape: f32[1,128], index: 4, kind: input, shape index: {}]   ;;  %s413_s5 = inlined_call_operand.vmem [shape: f32[1,128], index: 5, kind: input, shape index: {}]   ;;  %s414_s6 = inlined_call_operand.hbm [shape: bf16[16,128], index: 6, kind: output, shape index: {}]  }
   0x1   :  { %12 = vsyncpa [#allocation5], 0  ;;  %s322_s21 = smov [#allocation3]   ;;  %s274_s25 = scalar_lea.hbm %s409_s1, 256 }
   0x2   :  { %s20_s22 = sshll.u32 %s322_s21, 4  ;;  %p275_p0 = scmp.ne.s32.totalorder %s409_s1, %s274_s25  ;;  %s21_s22 = int_to_ptr.vmem [resolvable:$true] %s20_s22 }
   0x3   :  { %p278_p1 = scmp.lt.u32.totalorder %s274_s25, %s409_s1 }
   0x5   :  { %p280_p2 = pnand %p278_p1, %p275_p0 }
   0x7   :  { %283 = shalt.err (!%p280_p2)
}
   0x8   :  { %s284_s30 = scalar_lea.vmem %s21_s22, 256  ;;  %p289_p4 = scmp.lt.s32.totalorder %s21_s22, %s21_s22 }
   0x9   :  { %p285_p3 = scmp.ne.s32.totalorder %s21_s22, %s284_s30  ;;  %p290_p5 = scmp.lt.s32.totalorder %s284_s30, %s284_s30 }
   0xb   :  { %p291_p6 = por %p290_p5, %p289_p4 }
   0xd   :  { %p292_p7 = pnand %p291_p6, %p285_p3 }
   0xf   :  { %295 = shalt.err (!%p292_p7)
}
  0x10   :  { %s323_s7 = smov 64   ;;  %s324_s8 = smov 4  }
  0x11   :  { %26 = dma.hbm_to_vmem [thread:$0]  %s409_s1, 256, %s21_s22, [#allocation4], %s323_s7, %s323_s7, %s324_s8  }
  0x12   :  { %318 = dma.done.wait [#allocation4], 256  }
  0x13   :  { %319 = vsyncadd [#allocation4], 4294967040  ;;  %v325_v0 = vmov 0.0   ;;  %vm326_vm0 = vmmov 0   ;;  %vm134_vm1 = vcmask 1043456   ;;  %v270_v3 = vld [vmem:[#allocation3] sm:$0xff]  }
  0x14   :  { %258 = vmatprep.subr.bf16.mxu1 %v325_v0  ;;  %250 = vmatprep.subr.bf16.mxu0 %v325_v0  ;;  %v124_v1 = vld [vmem:[%s411_s3] sm:$0xf]  ;;  %vm130_vm2 = vcmask 64512   ;;  %v272_v5 = vld [vmem:[#allocation3 + $0x8] sm:$0xff]   ;;  %vm70_vm3 = vcmask 261120  }
  0x15   :  { %260 = vmatprep.mubr.msk.bf16.mxu1 %vm326_vm0, %v325_v0  ;;  %254 = vmatprep.mubr.msk.bf16.mxu0 %vm326_vm0, %v325_v0  ;;  %v136_v2 = vsel %vm134_vm1, %v124_v1, 0  ;;  %v271_v4 = vld [vmem:[%s410_s2] sm:$0xff]  }
  0x16   :  { %259 = vmatpush3.bf16.msra.mxu1 %v136_v2  ;;  %251 = vmatpush3.bf16.msra.mxu0 %v270_v3  ;;  %v273_v6 = vld [vmem:[%s408_s0] sm:$0xff]   ;;  %s327_s0 = smov [#allocation6]  }
  0x17   :  { %252 = vmatprep.subr.bf16.mxu0 %v325_v0  ;;  %v234_v7 = vld [vmem:[%s412_s4] ss:$0 sm:$0xff]  ;;  %s216_s18 = sshll.u32 %s327_s0, 4  ;;  %s217_s18 = int_to_ptr.vmem [resolvable:$true] %s216_s18 }
  0x18   :  { %v235_v17 = vld [vmem:[%s413_s5] ss:$0 sm:$0xff]  ;;  %s296_s4 = scalar_lea.vmem %s217_s18, 128  ;;  %p301_p9 = scmp.lt.s32.totalorder %s217_s18, %s217_s18 }
  0x19   :  { %261 = vmatmul.mubr.msk.bf16.vlgmr.msra.gmra.mrb[0].mxu1 %vm130_vm2, %v271_v4  ;;  %p297_p8 = scmp.ne.s32.totalorder %s217_s18, %s296_s4  ;;  %p302_p10 = scmp.lt.s32.totalorder %s296_s4, %s296_s4 }
  0x1a   :  { %253 = vmatpush3.bf16.msra.mxu0 %v272_v5 }
  0x1b   :  { %p303_p11 = por %p302_p10, %p301_p9 }
  0x1d   :  { %255 = vmatmul.mubr.msk.bf16.vlgmr.msra.gmra.mrb[0].mxu0 %vm70_vm3, %v273_v6  ;;  %p304_p12 = pnand %p303_p11, %p297_p8 }
  0xec   :  { %v172_v8 = vpop.f32.mrb[0].mxu1 }
  0xed   :  { %v262_v9 = vpop.f32.mrb[1].mxu1  ;;  %v188_v10 = vmul.f32 %v234_v7, %v172_v8 }
  0xee   :  { %v175_v11 = vpop.f32.mrb[2].mxu1 }
  0xef   :  { %v263_v12 = vpop.f32.mrb[3].mxu1  ;;  %v189_v14 = vmul.f32 %v234_v7, %v175_v11 }
  0xf0   :  { %v108_v13 = vpop.f32.mrb[0].mxu0 }
  0xf1   :  { %v190_v15 = vadd.f32 %v188_v10, %v108_v13  ;;  %v256_v16 = vpop.f32.mrb[1].mxu0 }
  0xf2   :  { %v111_v18 = vpop.f32.mrb[2].mxu0 }
  0xf3   :  { %v191_v19 = vadd.f32 %v189_v14, %v111_v18  ;;  %v257_v20 = vpop.f32.mrb[3].mxu0  ;;  %v199_v21 = vadd.f32 %v235_v17, %v190_v15 }
  0xf5   :  { %v200_v22 = vadd.f32 %v235_v17, %v191_v19 }
  0xf7   :  { %v243_v23 = vpack.c.bf16 %v200_v22, %v199_v21 }
  0xf9   :  { %244 = vst [vmem:[#allocation6] sm:$0xff] %v243_v23  }
  0xfa   :  { %307 = shalt.err (!%p304_p12)
}
  0xfb   :  { %s308_s5 = scalar_lea.hbm %s414_s6, 128 }
  0xfc   :  { %p309_p13 = scmp.ne.s32.totalorder %s414_s6, %s308_s5  ;;  %p312_p0 = scmp.lt.u32.totalorder %s308_s5, %s414_s6 }
  0xfe   :  { %p314_p1 = pnand %p312_p0, %p309_p13 }
 0x100   :  { %317 = shalt.err (!%p314_p1)
}
 0x101   :  { %222 = dma.vmem_to_hbm [thread:$0]  %s217_s18, 128, %s414_s6, [#allocation5], %s323_s7, %s323_s7, %s324_s8  }
 0x102   :  { %320 = dma.done.wait [#allocation5], 128  }
 0x103   :  { %321 = vsyncadd [#allocation5], 4294967168 }
 0x104   :  { %226 = vsyncpa [#allocation4], 1 }
 0x105   :  { %227 = vsyncpa [#allocation5], 1 }

</bundles_post_ra>
